<compile_context>
chip_gen: v7x
topology: tpu7x:2x2x1
jax: 0.10.0
libtpu: 0.0.40
codegen_flags: <defaults>
</compile_context>

<pallas_src>
import functools

import jax
import jax.numpy as jnp
from jax.experimental import pallas as pl
from jax.experimental.pallas import tpu as pltpu


def _cdiv(a, b):
    return -(-a // b)


def _round_up(a, b):
    return _cdiv(a, b) * b


def _make_stem_kernel(TH, TPo, Wpo, K, Cp, Ho, Wo, n_row_tiles):
    """Fused conv(+BN+ReLU)+maxpool kernel for one (batch, row-tile) grid step.

    Static sizes:
      TH  = 2*TPo conv-output rows per step, TPo = pool-output rows per step,
      Wpo = pool-output width, K = KH*KW*Cin, Cp = Cout rounded up to 128.
    """
    M = TH * 2 * Wpo
    mask_rows = n_row_tiles * TH > Ho
    mask_cols = 2 * Wpo > Wo

    def kernel(p_ref, w_ref, s_ref, b_ref, o_ref, halo_ref):
        # p_ref:    (1, TH, 2, Wpo, K)  im2col patches, W pre-split into (even, odd)
        # w_ref:    (K, Cp)             conv weight, (kh, kw, cin) x Cout
        # s_ref:    (1, Cp)             folded BN scale (gamma / sqrt(var + eps))
        # b_ref:    (1, Cp)             folded BN bias  (beta - mean * scale)
        # o_ref:    (1, TPo, Wpo, Cp)   pooled output tile
        # halo_ref: (1, 2, Wpo, Cp)     last conv row of the previous row tile
        r = pl.program_id(1)

        # First row tile of an image: the conv row above it is pool padding (zero).
        @pl.when(r == 0)
        def _():
            halo_ref[...] = jnp.zeros_like(halo_ref)

        # ---- convolution: a single (M, K) @ (K, Cp) matmul on the MXU ----
        lhs = p_ref[...].reshape(M, K)
        acc = jnp.dot(lhs, w_ref[...], preferred_element_type=jnp.float32)

        # ---- folded eval-mode BatchNorm + ReLU (f32, lane-dense) ----
        y = jnp.maximum(acc * s_ref[...] + b_ref[...], 0.0)
        y = y.reshape(TH, 2, Wpo, Cp)  # [conv_row, w_parity, w_half, channel]

        # Rows/cols that exist only because of tile padding must act like pool padding;
        # post-ReLU everything is >= 0, so forcing them to 0 is equivalent to -inf pad.
        if mask_rows or mask_cols:
            row = jax.lax.broadcasted_iota(jnp.int32, (TH, 2, Wpo, 1), 0) + r * TH
            par = jax.lax.broadcasted_iota(jnp.int32, (TH, 2, Wpo, 1), 1)
            half = jax.lax.broadcasted_iota(jnp.int32, (TH, 2, Wpo, 1), 2)
            valid = (row < Ho) & ((2 * half + par) < Wo)
            y = jnp.where(valid, y, 0.0)

        # ---- MaxPool2d(kernel=3, stride=2, padding=1) ----
        # H direction: pool row i needs conv rows {2i-1, 2i, 2i+1}; row "2i-1" of the
        # first pool row of this tile comes from the previous tile (or zero for r == 0).
        prev = halo_ref[...]                                  # (1, 2, Wpo, Cp)
        y_up = jnp.concatenate([prev, y[:TH - 1]], axis=0)    # y_up[l] == y[l-1]
        hm = jnp.maximum(y, y_up)                             # max(y[l-1], y[l])
        h_pair = hm.reshape(TPo, 2, 2, Wpo, Cp)[:, 0]         # max(y[2i-1], y[2i])
        h_next = y.reshape(TPo, 2, 2, Wpo, Cp)[:, 1]          # y[2i+1]
        z = jnp.maximum(h_pair, h_next)                       # (TPo, 2, Wpo, Cp)

        # W direction: pool col j needs conv cols {2j-1, 2j, 2j+1}
        #            = {odd[j-1], even[j], odd[j]}  (leading-dim even/odd planes,
        #              so no stride-2 sublane gathers; only a 1-col shift).
        z_even = z[:, 0]
        z_odd = z[:, 1]
        if Wpo > 1:
            z_odd_left = jnp.concatenate(
                [jnp.zeros((TPo, 1, Cp), jnp.float32), z_odd[:, :Wpo - 1]], axis=1)
        else:
            z_odd_left = jnp.zeros_like(z_odd)
        out = jnp.maximum(jnp.maximum(z_even, z_odd), z_odd_left)

        o_ref[...] = out.reshape(1, TPo, Wpo, Cp).astype(o_ref.dtype)

        # Carry this tile's last conv row for the next tile's first pool window.
        halo_ref[...] = y[TH - 1:TH]

    return kernel


@functools.partial(
    jax.jit,
    static_argnames=("stride", "padding", "eps", "block_pool_rows", "compute_dtype"))
def resnet2d_basic_stem(x, weight, gamma, beta, running_mean, running_var,
                        stride=(2, 2), padding=(3, 3), eps=1e-5,
                        block_pool_rows=16, compute_dtype=jnp.bfloat16):
    """Forward: Conv2d(no bias) -> BatchNorm2d(eval) -> ReLU -> MaxPool2d(3, 2, 1).

    Args:
      x:      (N, Cin, H, W)        NCHW input (like the PyTorch module).
      weight: (Cout, Cin, KH, KW)   conv weight.
      gamma, beta, running_mean, running_var: (Cout,) BatchNorm2d params / stats.
      block_pool_rows: pool-output rows per grid step (bounds per-step VMEM).
      compute_dtype: matmul operand dtype (bf16 recommended on v6e/v7x;
        jnp.float32 for exact f32 arithmetic). Accumulation is always f32.
    Returns:
      (N, Cout, Hpo, Wpo) NCHW output.
    """
    N, Cin, H, W = x.shape
    Cout, _, KH, KW = weight.shape
    SH, SW = stride
    PH, PW = padding

    Ho = (H + 2 * PH - KH) // SH + 1
    Wo = (W + 2 * PW - KW) // SW + 1
    Hpo = (Ho + 2 - 3) // 2 + 1
    Wpo = (Wo + 2 - 3) // 2 + 1

    K = KH * KW * Cin
    Cp = _round_up(Cout, 128)                 # lane-dense Cout
    TPo = max(1, min(block_pool_rows, Hpo))   # pool rows per grid step
    R = _cdiv(Hpo, TPo)                       # row tiles per image
    TH = 2 * TPo                              # conv rows per grid step
    Ho_pad = R * TH
    Wo_pad = 2 * Wpo

    # ---- im2col (wrapper glue, plain XLA): (N, Ho, Wo, K), K-order = (kh, kw, cin) ----
    x_nhwc = jnp.transpose(x, (0, 2, 3, 1)).astype(compute_dtype)
    x_sp = jnp.pad(x_nhwc, ((0, 0), (PH, PH), (PW, PW), (0, 0)))
    taps = []
    for kh in range(KH):
        for kw in range(KW):
            taps.append(jax.lax.slice(
                x_sp,
                (0, kh, kw, 0),
                (N, kh + (Ho - 1) * SH + 1, kw + (Wo - 1) * SW + 1, Cin),
                (1, SH, SW, 1)))
    patches = jnp.concatenate(taps, axis=-1)

    # Pad rows/cols to the tile grid and split W into (even, odd) column planes so the
    # pool's stride-2 W subsample becomes leading-dim indexing inside the kernel.
    patches = jnp.pad(patches, ((0, 0), (0, Ho_pad - Ho), (0, Wo_pad - Wo), (0, 0)))
    patches = patches.reshape(N, Ho_pad, Wpo, 2, K).transpose(0, 1, 3, 2, 4)
    # patches: (N, Ho_pad, 2, Wpo, K)

    # Weight (Cout, Cin, KH, KW) -> (K, Cp), matching the (kh, kw, cin) tap order.
    w2 = jnp.transpose(weight, (2, 3, 1, 0)).reshape(K, Cout).astype(compute_dtype)
    w2 = jnp.pad(w2, ((0, 0), (0, Cp - Cout)))

    # Fold eval-mode BatchNorm into a per-channel scale/bias (kept in f32).
    scale = (gamma / jnp.sqrt(running_var + eps)).astype(jnp.float32)
    bias = (beta - running_mean * scale).astype(jnp.float32)
    scale = jnp.pad(scale, (0, Cp - Cout)).reshape(1, Cp)
    bias = jnp.pad(bias, (0, Cp - Cout)).reshape(1, Cp)

    kernel = _make_stem_kernel(TH, TPo, Wpo, K, Cp, Ho, Wo, R)

    out = pl.pallas_call(
        kernel,
        out_shape=jax.ShapeDtypeStruct((N, R * TPo, Wpo, Cp), jnp.float32),
        grid_spec=pltpu.PrefetchScalarGridSpec(
            num_scalar_prefetch=0,
            grid=(N, R),
            in_specs=[
                pl.BlockSpec((1, TH, 2, Wpo, K), lambda n, r: (n, r, 0, 0, 0)),
                pl.BlockSpec((K, Cp), lambda n, r: (0, 0)),
                pl.BlockSpec((1, Cp), lambda n, r: (0, 0)),
                pl.BlockSpec((1, Cp), lambda n, r: (0, 0)),
            ],
            out_specs=pl.BlockSpec((1, TPo, Wpo, Cp), lambda n, r: (n, r, 0, 0)),
            scratch_shapes=[pltpu.VMEM((1, 2, Wpo, Cp), jnp.float32)],
        ),
        compiler_params=pltpu.CompilerParams(
            # Batch axis is independent (megacore-parallel on v7x); the row-tile axis is
            # sequential because of the 1-row pool halo carried in the VMEM scratch.
            dimension_semantics=("parallel", "arbitrary")),
    )(patches, w2, scale, bias)

    out = out[:, :Hpo, :, :Cout]
    return jnp.transpose(out, (0, 3, 1, 2))


def _reference_stem(x, weight, gamma, beta, running_mean, running_var,
                    stride, padding, eps, compute_dtype):
    """Pure-JAX reference (eval-mode BN), same operand precision as the kernel."""
    y = jax.lax.conv_general_dilated(
        x.astype(compute_dtype), weight.astype(compute_dtype),
        window_strides=stride,
        padding=[(padding[0], padding[0]), (padding[1], padding[1])],
        dimension_numbers=("NCHW", "OIHW", "NCHW"),
        preferred_element_type=jnp.float32)
    scale = gamma / jnp.sqrt(running_var + eps)
    bias = beta - running_mean * scale
    y = y * scale[None, :, None, None] + bias[None, :, None, None]
    y = jnp.maximum(y, 0.0)
    return jax.lax.reduce_window(
        y, -jnp.inf, jax.lax.max,
        window_dimensions=(1, 1, 3, 3),
        window_strides=(1, 1, 2, 2),
        padding=((0, 0), (0, 0), (1, 1), (1, 1)))


if __name__ == "__main__":
    key = jax.random.PRNGKey(0)
    k1, k2, k3, k4, k5, k6 = jax.random.split(key, 6)

    # Small shapes consistent with the module: RGB input, 7x7 / stride 2 / pad 3 stem.
    N, Cin, H, W = 2, 3, 16, 16
    Cout = 32
    kernel_hw = (7, 7)
    stride = (2, 2)
    padding = (3, 3)
    eps = 1e-5

    x = jax.random.normal(k1, (N, Cin, H, W), dtype=jnp.float32)
    weight = 0.1 * jax.random.normal(k2, (Cout, Cin, *kernel_hw), dtype=jnp.float32)
    gamma = 1.0 + 0.1 * jax.random.normal(k3, (Cout,), dtype=jnp.float32)
    beta = 0.1 * jax.random.normal(k4, (Cout,), dtype=jnp.float32)
    running_mean = 0.1 * jax.random.normal(k5, (Cout,), dtype=jnp.float32)
    running_var = jax.random.uniform(k6, (Cout,), dtype=jnp.float32,
                                     minval=0.5, maxval=1.5)

    out = resnet2d_basic_stem(x, weight, gamma, beta, running_mean, running_var,
                              stride=stride, padding=padding, eps=eps)
    out = jax.block_until_ready(out)

    # conv: 16 -> (16+6-7)//2+1 = 8 ; pool: 8 -> (8+2-3)//2+1 = 4
    assert out.shape == (N, Cout, 4, 4), out.shape
    assert bool(jnp.all(jnp.isfinite(out)))
    assert bool(jnp.all(out >= 0.0))  # relu -> maxpool keeps non-negativity

    ref = _reference_stem(x, weight, gamma, beta, running_mean, running_var,
                          stride, padding, eps, jnp.bfloat16)
    max_err = float(jnp.max(jnp.abs(out - ref)))
    assert max_err < 5e-3, max_err

    print("KERNEL_OK")
</pallas_src>

<mosaic_0001>
module attributes {stable_mosaic.version = 11 : i64} {
  func.func @kernel(%arg0: i32, %arg1: i32, %arg2: memref<1x8x2x4x147xbf16, #tpu.memory_space<vmem>>, %arg3: memref<147x128xbf16, #tpu.memory_space<vmem>>, %arg4: memref<1x128xf32, #tpu.memory_space<vmem>>, %arg5: memref<1x128xf32, #tpu.memory_space<vmem>>, %arg6: memref<1x4x4x128xf32, #tpu.memory_space<vmem>>, %arg7: memref<1x2x4x128xf32, #tpu.memory_space<vmem>>) attributes {dimension_semantics = [#tpu.dimension_semantics<parallel>, #tpu.dimension_semantics<arbitrary>], iteration_bounds = array<i64: 2, 1>, scalar_prefetch = 0 : i64, scratch_operands = 1 : i64, tpu.core_type = #tpu.core_type<tc>, window_params = [{transform_indices = @transform_0, window_bounds = array<i64: 1, 8, 2, 4, 147>}, {pipeline_mode = #tpu.pipeline_mode<synchronous>, transform_indices = @transform_1, window_bounds = array<i64: 147, 128>}, {pipeline_mode = #tpu.pipeline_mode<synchronous>, transform_indices = @transform_2, window_bounds = array<i64: 1, 128>}, {pipeline_mode = #tpu.pipeline_mode<synchronous>, transform_indices = @transform_3, window_bounds = array<i64: 1, 128>}, {transform_indices = @transform_4, window_bounds = array<i64: 1, 4, 4, 128>}]} {
    %c0_i32 = arith.constant 0 : i32
    %0 = arith.cmpi eq, %arg1, %c0_i32 : i32
    %1 = arith.extui %0 : i1 to i32
    %c0_i32_0 = arith.constant 0 : i32
    %2 = arith.cmpi ne, %1, %c0_i32_0 : i32
    scf.if %2 {
      %cst_25 = arith.constant 0.000000e+00 : f32
      %40 = vector.broadcast %cst_25 : f32 to vector<1x2x4x128xf32>
      %c0_26 = arith.constant 0 : index
      %c0_27 = arith.constant 0 : index
      %c0_28 = arith.constant 0 : index
      %c0_29 = arith.constant 0 : index
      %41 = vector.load %arg7[%c0_26, %c0_27, %c0_28, %c0_29] : memref<1x2x4x128xf32, #tpu.memory_space<vmem>>, vector<1x2x4x128xf32>
      tpu.vector_store %arg7[%c0_26, %c0_27, %c0_28, %c0_29], %40 {strides = array<i32>} : memref<1x2x4x128xf32, #tpu.memory_space<vmem>>, vector<1x2x4x128xf32>,
    } else {
    }
    %c0 = arith.constant 0 : index
    %c0_1 = arith.constant 0 : index
    %c0_2 = arith.constant 0 : index
    %c0_3 = arith.constant 0 : index
    %c0_4 = arith.constant 0 : index
    %3 = vector.load %arg2[%c0, %c0_1, %c0_2, %c0_3, %c0_4] : memref<1x8x2x4x147xbf16, #tpu.memory_space<vmem>>, vector<1x8x2x4x147xbf16>
    %4 = vector.shape_cast %3 : vector<1x8x2x4x147xbf16> to vector<64x147xbf16>
    %c0_5 = arith.constant 0 : index
    %c0_6 = arith.constant 0 : index
    %5 = vector.load %arg3[%c0_5, %c0_6] : memref<147x128xbf16, #tpu.memory_space<vmem>>, vector<147x128xbf16>
    %cst = arith.constant dense<0.000000e+00> : vector<64x128xf32>
    %6 = tpu.matmul %4, %5, %cst {dimension_numbers = #tpu.dot_dimension_numbers<[1], [0], [0], [1], [0, 0, 1, 1], [], []>} : vector<64x147xbf16>, vector<147x128xbf16>, vector<64x128xf32> -> vector<64x128xf32>
    %c0_7 = arith.constant 0 : index
    %c0_8 = arith.constant 0 : index
    %7 = vector.load %arg4[%c0_7, %c0_8] : memref<1x128xf32, #tpu.memory_space<vmem>>, vector<1x128xf32>
    %8 = vector.broadcast %7 : vector<1x128xf32> to vector<64x128xf32>
    %9 = arith.mulf %6, %8 : vector<64x128xf32>
    %c0_9 = arith.constant 0 : index
    %c0_10 = arith.constant 0 : index
    %10 = vector.load %arg5[%c0_9, %c0_10] : memref<1x128xf32, #tpu.memory_space<vmem>>, vector<1x128xf32>
    %11 = vector.broadcast %10 : vector<1x128xf32> to vector<64x128xf32>
    %12 = arith.addf %9, %11 : vector<64x128xf32>
    %cst_11 = arith.constant 0.000000e+00 : f32
    %13 = vector.broadcast %cst_11 : f32 to vector<64x128xf32>
    %14 = arith.maximumf %12, %13 : vector<64x128xf32>
    %15 = vector.shape_cast %14 : vector<64x128xf32> to vector<8x2x4x128xf32>
    %c0_12 = arith.constant 0 : index
    %c0_13 = arith.constant 0 : index
    %c0_14 = arith.constant 0 : index
    %c0_15 = arith.constant 0 : index
    %16 = vector.load %arg7[%c0_12, %c0_13, %c0_14, %c0_15] : memref<1x2x4x128xf32, #tpu.memory_space<vmem>>, vector<1x2x4x128xf32>
    %17 = vector.extract_strided_slice %15 {offsets = [0, 0, 0, 0], sizes = [7, 2, 4, 128], strides = [1, 1, 1, 1]} : vector<8x2x4x128xf32> to vector<7x2x4x128xf32>
    %18 = tpu.concatenate %16, %17 in 0 : vector<1x2x4x128xf32>, vector<7x2x4x128xf32> -> vector<8x2x4x128xf32>
    %19 = arith.maximumf %15, %18 : vector<8x2x4x128xf32>
    %20 = vector.shape_cast %19 : vector<8x2x4x128xf32> to vector<4x2x2x4x128xf32>
    %21 = vector.extract_strided_slice %20 {offsets = [0, 0, 0, 0, 0], sizes = [4, 1, 2, 4, 128], strides = [1, 1, 1, 1, 1]} : vector<4x2x2x4x128xf32> to vector<4x1x2x4x128xf32>
    %22 = vector.shape_cast %21 : vector<4x1x2x4x128xf32> to vector<4x2x4x128xf32>
    %23 = vector.shape_cast %15 : vector<8x2x4x128xf32> to vector<4x2x2x4x128xf32>
    %24 = vector.extract_strided_slice %23 {offsets = [0, 1, 0, 0, 0], sizes = [4, 1, 2, 4, 128], strides = [1, 1, 1, 1, 1]} : vector<4x2x2x4x128xf32> to vector<4x1x2x4x128xf32>
    %25 = vector.shape_cast %24 : vector<4x1x2x4x128xf32> to vector<4x2x4x128xf32>
    %26 = arith.maximumf %22, %25 : vector<4x2x4x128xf32>
    %27 = vector.extract_strided_slice %26 {offsets = [0, 0, 0, 0], sizes = [4, 1, 4, 128], strides = [1, 1, 1, 1]} : vector<4x2x4x128xf32> to vector<4x1x4x128xf32>
    %28 = vector.shape_cast %27 : vector<4x1x4x128xf32> to vector<4x4x128xf32>
    %29 = vector.extract_strided_slice %26 {offsets = [0, 1, 0, 0], sizes = [4, 1, 4, 128], strides = [1, 1, 1, 1]} : vector<4x2x4x128xf32> to vector<4x1x4x128xf32>
    %30 = vector.shape_cast %29 : vector<4x1x4x128xf32> to vector<4x4x128xf32>
    %cst_16 = arith.constant 0.000000e+00 : f32
    %31 = vector.broadcast %cst_16 : f32 to vector<4x1x128xf32>
    %32 = vector.extract_strided_slice %30 {offsets = [0, 0, 0], sizes = [4, 3, 128], strides = [1, 1, 1]} : vector<4x4x128xf32> to vector<4x3x128xf32>
    %33 = tpu.concatenate %31, %32 in 1 : vector<4x1x128xf32>, vector<4x3x128xf32> -> vector<4x4x128xf32>
    %34 = arith.maximumf %28, %30 : vector<4x4x128xf32>
    %35 = arith.maximumf %34, %33 : vector<4x4x128xf32>
    %36 = vector.shape_cast %35 : vector<4x4x128xf32> to vector<1x4x4x128xf32>
    %c0_17 = arith.constant 0 : index
    %c0_18 = arith.constant 0 : index
    %c0_19 = arith.constant 0 : index
    %c0_20 = arith.constant 0 : index
    %37 = vector.load %arg6[%c0_17, %c0_18, %c0_19, %c0_20] : memref<1x4x4x128xf32, #tpu.memory_space<vmem>>, vector<1x4x4x128xf32>
    tpu.vector_store %arg6[%c0_17, %c0_18, %c0_19, %c0_20], %36 {strides = array<i32>} : memref<1x4x4x128xf32, #tpu.memory_space<vmem>>, vector<1x4x4x128xf32>,
    %38 = vector.extract_strided_slice %15 {offsets = [7, 0, 0, 0], sizes = [1, 2, 4, 128], strides = [1, 1, 1, 1]} : vector<8x2x4x128xf32> to vector<1x2x4x128xf32>
    %c0_21 = arith.constant 0 : index
    %c0_22 = arith.constant 0 : index
    %c0_23 = arith.constant 0 : index
    %c0_24 = arith.constant 0 : index
    %39 = vector.load %arg7[%c0_21, %c0_22, %c0_23, %c0_24] : memref<1x2x4x128xf32, #tpu.memory_space<vmem>>, vector<1x2x4x128xf32>
    tpu.vector_store %arg7[%c0_21, %c0_22, %c0_23, %c0_24], %38 {strides = array<i32>} : memref<1x2x4x128xf32, #tpu.memory_space<vmem>>, vector<1x2x4x128xf32>,
    return
  }
  func.func @transform_0(%arg0: i32, %arg1: i32) -> (i32, i32, i32, i32, i32) {
    %c0_i32 = arith.constant 0 : i32
    %c0_i32_0 = arith.constant 0 : i32
    %c0_i32_1 = arith.constant 0 : i32
    %c0_i32_2 = arith.constant 0 : i32
    return %arg0, %arg1, %c0_i32, %c0_i32_0, %c0_i32_1 : i32, i32, i32, i32, i32
  }
  func.func @transform_1(%arg0: i32, %arg1: i32) -> (i32, i32) {
    %c0_i32 = arith.constant 0 : i32
    %c0_i32_0 = arith.constant 0 : i32
    %c0_i32_1 = arith.constant 0 : i32
    return %c0_i32, %c0_i32_0 : i32, i32
  }
  func.func @transform_2(%arg0: i32, %arg1: i32) -> (i32, i32) {
    %c0_i32 = arith.constant 0 : i32
    %c0_i32_0 = arith.constant 0 : i32
    %c0_i32_1 = arith.constant 0 : i32
    return %c0_i32, %c0_i32_0 : i32, i32
  }
  func.func @transform_3(%arg0: i32, %arg1: i32) -> (i32, i32) {
    %c0_i32 = arith.constant 0 : i32
    %c0_i32_0 = arith.constant 0 : i32
    %c0_i32_1 = arith.constant 0 : i32
    return %c0_i32, %c0_i32_0 : i32, i32
  }
  func.func @transform_4(%arg0: i32, %arg1: i32) -> (i32, i32, i32, i32) {
    %c0_i32 = arith.constant 0 : i32
    %c0_i32_0 = arith.constant 0 : i32
    %c0_i32_1 = arith.constant 0 : i32
    return %arg0, %arg1, %c0_i32, %c0_i32_0 : i32, i32, i32, i32
  }
}

</mosaic_0001>

<bundles_post_ra>
// kernel: resnet2d_basic_stem.1
= control target key start
LH: loop header
LB: loop body
LE: loop exit
PB: predicated region body
PF: predicated region fallthrough
CT: control target
= control target key end

     0   :  { %s871_s15 = smov 0   ;;  %s873_s16 = smov 0   ;;  %s989_s0 = inlined_call_operand.vmem [shape: bf16[2,8,2,4,147], index: 0, kind: input, shape index: {}]   ;;  %s990_s1 = inlined_call_operand.vmem [shape: bf16[147,128], index: 1, kind: input, shape index: {}]   ;;  %s991_s2 = inlined_call_operand.vmem [shape: f32[1,128], index: 2, kind: input, shape index: {}]   ;;  %s992_s3 = inlined_call_operand.vmem [shape: f32[1,128], index: 3, kind: input, shape index: {}]   ;;  %s993_s4 = inlined_call_operand.vmem [shape: f32[2,4,4,128], index: 4, kind: output, shape index: {}]  }
   0x1   :  { %s875_s17 = smov 0  }
   0x2 LB: > { %s26_s18 = sadd.s32 1, %s837_s16  ;;  %p720_p0 = scmp.ge.s32.totalorder %s841_s17, 1  ;;  %s841_s17 = sphi %s875_s17, %s14_s17   ;;  %s837_s16 = sphi %s873_s16, %s995_s16   ;;  %s833_s15 = sphi %s871_s15, %s994_s15  }
   0x3   : > { %p28_p1 = scmp.ge.s32.totalorder %s26_s18, 2  ;;  %p184_p2 = scmp.lt.s32.totalorder %s841_s17, 3 }
   0x5   : > { %s997_s18 = smov (%p28_p1, %s26_s18), 0  ;;  %p185_p3 = pnand %p720_p0, %p184_p2 }
   0x6   : > { %v793_v0 = vld [vmem:[%s990_s1] sm:$0xff] (!%p185_p3)   ;;  %v843_v1 = vmov (!%p185_p3), 0   ;;  %v794_v2 = vld [vmem:[%s990_s1 + $0x8] sm:$0xff] (!%p185_p3)   ;;  %v795_v3 = vld [vmem:[%s990_s1 + $0x10] sm:$0xff] (!%p185_p3)   ;;  %p220_p4 = scmp.lt.s32.totalorder (!%p185_p3), %s833_s15, 1  ;;  %v844_v5 = vmov (!%p185_p3), 0.0  }
   0x7   : > { %188 = sbr.rel (%p185_p3) target bundleno = 287 (0x11f), region = 36  ;;  %451 = vmatprep.subr.bf16.mxu0 (!%p185_p3), %v843_v1  ;;  %745 = vmatprep.subr.bf16.mxu1 (!%p185_p3), %v843_v1  ;;  %v796_v4 = vld [vmem:[%s990_s1 + $0x18] sm:$0xff] (!%p185_p3)   ;;  %245 = vst [vmem:[#allocation2] sm:$0xf] (!%p185_p3), %v844_v5  ;;  %246 = vst [vmem:[#allocation2 + $0x4] sm:$0xf] (!%p185_p3), %v844_v5 }
   0x8   : > { %452 = vmatpush1.bf16.msra.mxu0 (!%p185_p3), %v793_v0  ;;  %755 = vmatpush1.bf16.msra.mxu1 (!%p185_p3), %v793_v0  ;;  %v797_v6 = vld [vmem:[%s990_s1 + $0x20] sm:$0xff] (!%p185_p3)   ;;  %vm431_vm0 = vcmask (!%p185_p3), 154624   ;;  %v798_v11 = vld [vmem:[%s990_s1 + $0x28] sm:$0xff] (!%p185_p3)   ;;  %v799_v14 = vld [vmem:[%s990_s1 + $0x30] sm:$0xff] (!%p185_p3)   ;;  %vm444_vm1 = vcmask (!%p185_p3), 1040384   ;;  %vm445_vm2 = vcmask (!%p185_p3), 1041408  }
   0x9   : > { %453 = vmatprep.subr.bf16.mxu0 (!%p185_p3), %v843_v1  ;;  %746 = vmatprep.subr.bf16.mxu1 (!%p185_p3), %v843_v1  ;;  %v800_v15 = vld [vmem:[%s990_s1 + $0x38] sm:$0xff] (!%p185_p3)   ;;  %v845_v16 = vmov (!%p185_p3), 65535   ;;  %v801_v18 = vld [vmem:[%s990_s1 + $0x40] sm:$0xff] (!%p185_p3)   ;;  %v802_v19 = vld [vmem:[%s990_s1 + $0x48] ss:$0 sps:$4 sm:$0x33] (!%p185_p3)  }
   0xa   : > { %v446_v17 = vsel (!%p185_p3), %vm444_vm1, 4294967295, %v845_v16  ;;  %v739_v32 = vld [vmem:[%s991_s2] ss:$0 sm:$0xff] (!%p185_p3) }
   0xb   : > { %v447_v21 = vsel (!%p185_p3), %vm445_vm2, %v446_v17, 0  ;;  %v740_v34 = vld [vmem:[%s992_s3] ss:$0 sm:$0xff] (!%p185_p3) }
   0xc   : > { %454 = vmatpush1.bf16.msra.mxu0 (!%p185_p3), %v794_v2  ;;  %756 = vmatpush1.bf16.msra.mxu1 (!%p185_p3), %v794_v2  ;;  %v449_v25 = vand.u32 (!%p185_p3), %v802_v19, %v447_v21 }
   0xd   : > { %455 = vmatprep.subr.bf16.mxu0 (!%p185_p3), %v843_v1  ;;  %747 = vmatprep.subr.bf16.mxu1 (!%p185_p3), %v843_v1 }
   0xe   : > { %s999_s15 = smov (!%p220_p4, %s833_s15), 1  ;;  %v578_v47 = vld [vmem:[#allocation2] sm:$0xf]  ;;  %v579_v50 = vld [vmem:[#allocation2 + $0x4] sm:$0xf] }
   0xf   : > { %s743_s27 = sshll.u32 %s999_s15, 6  ;;  %s744_s25 = sshll.u32 %s999_s15, 4 }
  0x10   : > { %456 = vmatpush1.bf16.msra.mxu0 %v795_v3  ;;  %757 = vmatpush1.bf16.msra.mxu1 %v795_v3  ;;  %s915_s30 = scalar_lea.vmem %s989_s0, %s743_s27  ;;  %s970_s28 = scalar_lea.vmem %s993_s4, %s744_s25 }
  0x11   : > { %457 = vmatprep.subr.bf16.mxu0 %v843_v1  ;;  %748 = vmatprep.subr.bf16.mxu1 %v843_v1  ;;  %v811_v7 = vld.sshfl [vmem:[%s915_s30] sm:$0xff pattern:$0x76325410]  ;;  %v812_v8 = vld.sshfl [vmem:[%s915_s30 + $0x8] sm:$0xff pattern:$0x76325410] }
  0x12   : > { %v813_v9 = vld.sshfl [vmem:[%s915_s30 + $0x20] sm:$0xff pattern:$0x76325410]  ;;  %v814_v10 = vld.sshfl [vmem:[%s915_s30 + $0x28] sm:$0xff pattern:$0x76325410]  ;;  %v315_v12 = vcombine.high %v811_v7, %v812_v8  ;;  %v314_v26 = vcombine.low %v811_v7, %v812_v8 }
  0x13   : > { %v351_v13 = vcombine.high %v813_v9, %v814_v10  ;;  %v815_v20 = vld.sshfl [vmem:[%s915_s30 + $0x10] sm:$0xff pattern:$0x76325410]  ;;  %v816_v22 = vld.sshfl [vmem:[%s915_s30 + $0x18] sm:$0xff pattern:$0x76325410]  ;;  %v350_v27 = vcombine.low %v813_v9, %v814_v10 }
  0x14   : > { %458 = vmatpush1.bf16.msra.mxu0 %v796_v4  ;;  %758 = vmatpush1.bf16.msra.mxu1 %v796_v4  ;;  %v817_v23 = vld.sshfl [vmem:[%s915_s30 + $0x30] sm:$0xff pattern:$0x76325410]  ;;  %v818_v24 = vld.sshfl [vmem:[%s915_s30 + $0x38] sm:$0xff pattern:$0x76325410]  ;;  %v333_v28 = vcombine.high %v815_v20, %v816_v22  ;;  %v332_v30 = vcombine.low %v815_v20, %v816_v22 }
  0x15   : > { %459 = vmatprep.subr.bf16.mxu0 %v843_v1  ;;  %749 = vmatprep.subr.bf16.mxu1 %v843_v1  ;;  %v369_v29 = vcombine.high %v817_v23, %v818_v24  ;;  %v368_v31 = vcombine.low %v817_v23, %v818_v24 }
  0x16   : > { %735 = vmatprep.mubr.msk.bf16.mxu0 %vm431_vm0, %v315_v12  ;;  %737 = vmatprep.mubr.msk.bf16.mxu1 %vm431_vm0, %v351_v13 }
  0x18   : > { %460 = vmatpush1.bf16.msra.mxu0 %v797_v6  ;;  %759 = vmatpush1.bf16.msra.mxu1 %v797_v6 }
  0x19   : > { %461 = vmatprep.subr.bf16.mxu0 %v843_v1  ;;  %750 = vmatprep.subr.bf16.mxu1 %v843_v1 }
  0x1c   : > { %462 = vmatpush1.bf16.msra.mxu0 %v798_v11  ;;  %760 = vmatpush1.bf16.msra.mxu1 %v798_v11 }
  0x1d   : > { %463 = vmatprep.subr.bf16.mxu0 %v843_v1  ;;  %751 = vmatprep.subr.bf16.mxu1 %v843_v1 }
  0x20   : > { %464 = vmatpush1.bf16.msra.mxu0 %v799_v14  ;;  %761 = vmatpush1.bf16.msra.mxu1 %v799_v14 }
  0x21   : > { %465 = vmatprep.subr.bf16.mxu0 %v843_v1  ;;  %752 = vmatprep.subr.bf16.mxu1 %v843_v1 }
  0x24   : > { %466 = vmatpush1.bf16.msra.mxu0 %v800_v15  ;;  %762 = vmatpush1.bf16.msra.mxu1 %v800_v15 }
  0x25   : > { %467 = vmatprep.subr.bf16.mxu0 %v843_v1  ;;  %753 = vmatprep.subr.bf16.mxu1 %v843_v1 }
  0x28   : > { %468 = vmatpush1.bf16.msra.mxu0 %v801_v18  ;;  %763 = vmatpush1.bf16.msra.mxu1 %v801_v18 }
  0x29   : > { %469 = vmatprep.subr.bf16.mxu0 %v843_v1  ;;  %754 = vmatprep.subr.bf16.mxu1 %v843_v1 }
  0x2c   : > { %470 = vmatpush1.bf16.msra.mxu0 %v449_v25  ;;  %764 = vmatpush1.bf16.msra.mxu1 %v449_v25 }
  0x2f   : > { %484 = vmatmul.mubr.bf16.vlgmr.msra.gmra.mrb[0].mxu0 %v314_v26  ;;  %500 = vmatmul.mubr.bf16.vlgmr.msra.gmra.mrb[0].mxu1 %v350_v27 }
  0x30   : > { %736 = vmatprep.mubr.msk.bf16.mxu0 %vm431_vm0, %v333_v28  ;;  %738 = vmatprep.mubr.msk.bf16.mxu1 %vm431_vm0, %v369_v29 }
  0x37   : > { %492 = vmatmul.mubr.bf16.gmra.mrb[4].mxu0 %v332_v30  ;;  %508 = vmatmul.mubr.bf16.gmra.mrb[4].mxu1 %v368_v31 }
 0x102   : > { %v485_v33 = vpop.f32.mrb[0].mxu0  ;;  %v501_v35 = vpop.f32.mrb[0].mxu1 }
 0x103   : > { %v523_v36 = vmul.f32 %v739_v32, %v485_v33  ;;  %v487_v37 = vpop.f32.mrb[1].mxu0  ;;  %v503_v38 = vpop.f32.mrb[1].mxu1  ;;  %v527_v39 = vmul.f32 %v739_v32, %v501_v35 }
 0x104   : > { %v488_v40 = vpop.f32.mrb[2].mxu0  ;;  %v504_v41 = vpop.f32.mrb[2].mxu1 }
 0x105   : > { %v538_v42 = vadd.f32 %v740_v34, %v523_v36  ;;  %v524_v43 = vmul.f32 %v739_v32, %v488_v40  ;;  %v528_v44 = vmul.f32 %v739_v32, %v504_v41  ;;  %v490_v45 = vpop.f32.mrb[3].mxu0  ;;  %v506_v46 = vpop.f32.mrb[3].mxu1  ;;  %v542_v51 = vadd.f32 %v740_v34, %v527_v39 }
 0x107   : > { %v546_v48 = vmax.f32 %v538_v42, 0.0  ;;  %v539_v49 = vadd.f32 %v740_v34, %v524_v43  ;;  %v543_v52 = vadd.f32 %v740_v34, %v528_v44  ;;  %v550_v0 = vmax.f32 %v542_v51, 0.0 }
 0x109   : > { %v562_v53 = vcombine.high %v546_v48, %v546_v48  ;;  %v580_v54 = vmax.f32 %v546_v48, %v578_v47  ;;  %v547_v55 = vmax.f32 %v539_v49, 0.0  ;;  %v551_v1 = vmax.f32 %v543_v52, 0.0 }
 0x10a   : > { %v493_v56 = vpop.f32.mrb[4].mxu0  ;;  %v509_v57 = vpop.f32.mrb[4].mxu1  ;;  %v566_v16 = vcombine.high %v550_v0, %v550_v0 }
 0x10b   : > { %v581_v58 = vmax.f32 %v562_v53, %v579_v50  ;;  %v563_v59 = vcombine.high %v547_v55, %v547_v55  ;;  %v588_v60 = vmax.f32 %v580_v54, %v547_v55  ;;  %v525_v61 = vmul.f32 %v739_v32, %v493_v56  ;;  %v495_v62 = vpop.f32.mrb[5].mxu0  ;;  %v511_v63 = vpop.f32.mrb[5].mxu1 }
 0x10c   : > { %v529_v2 = vmul.f32 %v739_v32, %v509_v57  ;;  %v496_v3 = vpop.f32.mrb[6].mxu0  ;;  %v512_v4 = vpop.f32.mrb[6].mxu1  ;;  %v567_v17 = vcombine.high %v551_v1, %v551_v1 }
 0x10d   : > { %v589_v5 = vmax.f32 %v581_v58, %v563_v59  ;;  %v540_v6 = vadd.f32 %v740_v34, %v525_v61  ;;  %v526_v7 = vmul.f32 %v739_v32, %v496_v3  ;;  %v530_v8 = vmul.f32 %v739_v32, %v512_v4  ;;  %v498_v9 = vpop.f32.mrb[7].mxu0  ;;  %v514_v10 = vpop.f32.mrb[7].mxu1 }
 0x10e   : > { %v544_v11 = vadd.f32 %v740_v34, %v529_v2 }
 0x10f   : > { %v600_v12 = vrot.slane %v589_v5, 7  ;;  %v612_v13 = vmax.f32 %v588_v60, %v589_v5  ;;  %v548_v14 = vmax.f32 %v540_v6, 0.0  ;;  %v541_v15 = vadd.f32 %v740_v34, %v526_v7 }
 0x110   : > { %v552_v18 = vmax.f32 %v544_v11, 0.0  ;;  %v545_v19 = vadd.f32 %v740_v34, %v530_v8 }
 0x111   : > { %v608_v20 = vsel %vm444_vm1, 0.0, %v600_v12  ;;  %v564_v21 = vcombine.high %v548_v14, %v548_v14  ;;  %v582_v22 = vmax.f32 %v548_v14, %v547_v55  ;;  %v549_v23 = vmax.f32 %v541_v15, 0.0 }
 0x112   : > { %v616_v24 = vmax.f32 %v612_v13, %v608_v20  ;;  %v568_v25 = vcombine.high %v552_v18, %v552_v18  ;;  %v586_v26 = vmax.f32 %v552_v18, %v551_v1  ;;  %v553_v27 = vmax.f32 %v545_v19, 0.0 }
 0x113   : > { %v583_v28 = vmax.f32 %v564_v21, %v563_v59  ;;  %v565_v29 = vcombine.high %v549_v23, %v549_v23  ;;  %v584_v30 = vmax.f32 %v550_v0, %v549_v23  ;;  %v590_v31 = vmax.f32 %v582_v22, %v549_v23 }
 0x114   : > { %620 = vst [vmem:[%s970_s28] sm:$0xf] %v616_v24  ;;  %v587_v32 = vmax.f32 %v568_v25, %v567_v17  ;;  %v569_v33 = vcombine.high %v553_v27, %v553_v27  ;;  %v594_v34 = vmax.f32 %v586_v26, %v553_v27  ;;  %624 = vst [vmem:[#allocation2] sm:$0xf] %v553_v27 }
 0x115   : > { %v585_v35 = vmax.f32 %v566_v16, %v565_v29  ;;  %v591_v36 = vmax.f32 %v583_v28, %v565_v29  ;;  %v592_v37 = vmax.f32 %v584_v30, %v551_v1 }
 0x116   : > { %v595_v38 = vmax.f32 %v587_v32, %v569_v33  ;;  %625 = vst [vmem:[#allocation2 + $0x4] sm:$0xf] %v569_v33 }
 0x117   : > { %v593_v39 = vmax.f32 %v585_v35, %v567_v17  ;;  %v601_v40 = vrot.slane %v591_v36, 7  ;;  %v613_v41 = vmax.f32 %v590_v31, %v591_v36 }
 0x118   : > { %v603_v42 = vrot.slane %v595_v38, 7  ;;  %v615_v43 = vmax.f32 %v594_v34, %v595_v38 }
 0x119   : > { %v602_v44 = vrot.slane %v593_v39, 7  ;;  %v609_v45 = vsel %vm444_vm1, 0.0, %v601_v40  ;;  %v614_v46 = vmax.f32 %v592_v37, %v593_v39 }
 0x11a   : > { %v617_v47 = vmax.f32 %v613_v41, %v609_v45  ;;  %v611_v48 = vsel %vm444_vm1, 0.0, %v603_v42 }
 0x11b   : > { %v610_v49 = vsel %vm444_vm1, 0.0, %v602_v44  ;;  %v619_v50 = vmax.f32 %v615_v43, %v611_v48 }
 0x11c   : > { %v618_v51 = vmax.f32 %v614_v46, %v610_v49  ;;  %621 = vst [vmem:[%s970_s28 + $0x4] sm:$0xf] %v617_v47 }
 0x11d   : > { %623 = vst [vmem:[%s970_s28 + $0xc] sm:$0xf] %v619_v50 }
 0x11e   : > { %622 = vst [vmem:[%s970_s28 + $0x8] sm:$0xf] %v618_v51 }
 0x11f PF: > { %s14_s17 = sadd.s32 1, %s841_s17   ;;  %s994_s15 = smov %s837_s16 }
 0x120   : > { %p11_p5 = scmp.ge.s32.totalorder %s14_s17, 4   ;;  %s995_s16 = smov %s997_s18 }
 0x122   :  { %13 = sbr.rel (!%p11_p5) target bundleno = 2 (0x2), region = 70 }

</bundles_post_ra>
